<compile_context>
chip_gen: v5e
topology: v5e:2x2
jax: 0.10.0
libtpu: 0.0.40
codegen_flags: <defaults>
</compile_context>

<pallas_src>
import math

import jax
import jax.numpy as jnp
from jax.experimental import pallas as pl
from jax.experimental.pallas import tpu as pltpu

_NEG_BIG = jnp.float32(-1e30)  # finite "-inf" for padded logit columns


def _mlp_softmax_kernel(x_ref, w1_ref, b1_ref, w2_ref, b2_ref, w3_ref, b3_ref,
                        o_ref):
    """Fused 3-layer MLP + row softmax on one (TB, K) batch tile."""
    x = x_ref[...]  # already float32

    # Layer 1: Linear + ReLU (MXU matmul, f32 accumulate; VPU max)
    h1 = jnp.dot(x, w1_ref[...], preferred_element_type=jnp.float32)
    h1 = jnp.maximum(h1 + b1_ref[...], 0.0)

    # Layer 2: Linear + ReLU
    h2 = jnp.dot(h1, w2_ref[...], preferred_element_type=jnp.float32)
    h2 = jnp.maximum(h2 + b2_ref[...], 0.0)

    # Layer 3: Linear (output columns padded to 128 lanes; pad bias = -1e30)
    logits = jnp.dot(h2, w3_ref[...], preferred_element_type=jnp.float32)
    logits = logits + b3_ref[...]

    # Numerically stable softmax over the last axis. Padded columns contribute
    # exp(-1e30 - m) == 0 to the denominator, so real columns are unaffected.
    m = jnp.max(logits, axis=-1, keepdims=True)
    e = jnp.exp(logits - m)
    denom = jnp.sum(e, axis=-1, keepdims=True)
    o_ref[...] = (e * pl.reciprocal(denom, approx=True)).astype(o_ref.dtype)


def _round_up(n, m):
    return ((n + m - 1) // m) * m


def portfolio_optimizer_forward(x, params, *, tb=256):
    """x: (B, input_size) float32. params: dict of w1,b1,w2,b2,w3,b3."""
    w1, b1, w2, b2, w3, b3 = (params["w1"], params["b1"], params["w2"],
                              params["b2"], params["w3"], params["b3"])
    B, K = x.shape
    H = w1.shape[1]
    out_size = w3.shape[1]

    # Wrapper-side padding: K -> multiple of 8 (sublane-aligned w1),
    # out -> multiple of 128 (lane-dense stores), B -> multiple of TB.
    k_pad = _round_up(K, 8)
    n_pad = _round_up(out_size, 128)
    b_pad = _round_up(B, tb)

    x_p = jnp.pad(x.astype(jnp.float32), ((0, b_pad - B), (0, k_pad - K)))
    w1_p = jnp.pad(w1, ((0, k_pad - K), (0, 0)))
    w3_p = jnp.pad(w3, ((0, 0), (0, n_pad - out_size)))
    # Pad bias columns with a huge negative so softmax assigns them zero mass.
    b3_p = jnp.pad(b3, ((0, 0), (0, n_pad - out_size)),
                   constant_values=_NEG_BIG)

    grid = (b_pad // tb,)

    # x / out stream over the batch grid; weights use constant index_maps so
    # they are fetched once and stay resident in VMEM across grid steps.
    const2 = lambda a: pl.BlockSpec(a.shape, lambda i: (0, 0))
    in_specs = [
        pl.BlockSpec((tb, k_pad), lambda i: (i, 0)),   # x tile
        const2(w1_p), const2(b1),
        const2(w2), const2(b2),
        const2(w3_p), const2(b3_p),
    ]
    out_spec = pl.BlockSpec((tb, n_pad), lambda i: (i, 0))

    out_padded = pl.pallas_call(
        _mlp_softmax_kernel,
        out_shape=jax.ShapeDtypeStruct((b_pad, n_pad), jnp.float32),
        grid=grid,
        in_specs=in_specs,
        out_specs=out_spec,
        compiler_params=pltpu.CompilerParams(
            dimension_semantics=("parallel",)),
    )(x_p, w1_p, b1, w2, b2, w3_p, b3_p)

    return out_padded[:B, :out_size]


def init_params(key, input_size=5, hidden_size=128, output_size=5):
    """Deterministic init mimicking PyTorch nn.Linear default
    (uniform(-1/sqrt(fan_in), +1/sqrt(fan_in)))."""
    ks = jax.random.split(key, 6)

    def lin(kw, kb, fan_in, fan_out):
        bound = 1.0 / math.sqrt(fan_in)
        w = jax.random.uniform(kw, (fan_in, fan_out), jnp.float32, -bound, bound)
        b = jax.random.uniform(kb, (1, fan_out), jnp.float32, -bound, bound)
        return w, b

    w1, b1 = lin(ks[0], ks[1], input_size, hidden_size)
    w2, b2 = lin(ks[2], ks[3], hidden_size, hidden_size)
    w3, b3 = lin(ks[4], ks[5], hidden_size, output_size)
    return {"w1": w1, "b1": b1, "w2": w2, "b2": b2, "w3": w3, "b3": b3}


def reference_forward(x, p):
    h1 = jax.nn.relu(x @ p["w1"] + p["b1"])
    h2 = jax.nn.relu(h1 @ p["w2"] + p["b2"])
    logits = h2 @ p["w3"] + p["b3"]
    return jax.nn.softmax(logits, axis=1)


if __name__ == "__main__":
    key = jax.random.PRNGKey(0)
    k_param, k_x = jax.random.split(key)

    input_size, hidden_size, output_size = 5, 128, 5
    batch = 8

    params = init_params(k_param, input_size, hidden_size, output_size)
    x = jax.random.normal(k_x, (batch, input_size), jnp.float32)

    fwd = jax.jit(portfolio_optimizer_forward)
    out = fwd(x, params)
    out = jax.block_until_ready(out)

    ref = reference_forward(x, params)
    assert out.shape == (batch, output_size)
    assert jnp.allclose(out, ref, atol=1e-4, rtol=1e-4)
    # softmax rows sum to 1 (approx reciprocal => allow 1e-4)
    assert jnp.allclose(jnp.sum(out, axis=1), jnp.ones((batch,)), atol=1e-4)

    print("KERNEL_OK")
</pallas_src>

<mosaic_0001>
module attributes {stable_mosaic.version = 11 : i64} {
  func.func @_mlp_softmax_kernel(%arg0: i32, %arg1: memref<256x8xf32, #tpu.memory_space<vmem>>, %arg2: memref<8x128xf32, #tpu.memory_space<vmem>>, %arg3: memref<1x128xf32, #tpu.memory_space<vmem>>, %arg4: memref<128x128xf32, #tpu.memory_space<vmem>>, %arg5: memref<1x128xf32, #tpu.memory_space<vmem>>, %arg6: memref<128x128xf32, #tpu.memory_space<vmem>>, %arg7: memref<1x128xf32, #tpu.memory_space<vmem>>, %arg8: memref<256x128xf32, #tpu.memory_space<vmem>>) attributes {dimension_semantics = [#tpu.dimension_semantics<parallel>], iteration_bounds = array<i64: 1>, scalar_prefetch = 0 : i64, scratch_operands = 0 : i64, tpu.core_type = #tpu.core_type<tc>, window_params = [{transform_indices = @transform_0, window_bounds = array<i64: 256, 8>}, {pipeline_mode = #tpu.pipeline_mode<synchronous>, transform_indices = @transform_1, window_bounds = array<i64: 8, 128>}, {pipeline_mode = #tpu.pipeline_mode<synchronous>, transform_indices = @transform_2, window_bounds = array<i64: 1, 128>}, {pipeline_mode = #tpu.pipeline_mode<synchronous>, transform_indices = @transform_3, window_bounds = array<i64: 128, 128>}, {pipeline_mode = #tpu.pipeline_mode<synchronous>, transform_indices = @transform_4, window_bounds = array<i64: 1, 128>}, {pipeline_mode = #tpu.pipeline_mode<synchronous>, transform_indices = @transform_5, window_bounds = array<i64: 128, 128>}, {pipeline_mode = #tpu.pipeline_mode<synchronous>, transform_indices = @transform_6, window_bounds = array<i64: 1, 128>}, {transform_indices = @transform_7, window_bounds = array<i64: 256, 128>}]} {
    %c0 = arith.constant 0 : index
    %c0_0 = arith.constant 0 : index
    %0 = vector.load %arg1[%c0, %c0_0] : memref<256x8xf32, #tpu.memory_space<vmem>>, vector<256x8xf32>
    %c0_1 = arith.constant 0 : index
    %c0_2 = arith.constant 0 : index
    %1 = vector.load %arg2[%c0_1, %c0_2] : memref<8x128xf32, #tpu.memory_space<vmem>>, vector<8x128xf32>
    %cst = arith.constant dense<0.000000e+00> : vector<256x128xf32>
    %2 = tpu.matmul %0, %1, %cst {dimension_numbers = #tpu.dot_dimension_numbers<[1], [0], [0], [1], [0, 0, 1, 1], [], []>} : vector<256x8xf32>, vector<8x128xf32>, vector<256x128xf32> -> vector<256x128xf32>
    %c0_3 = arith.constant 0 : index
    %c0_4 = arith.constant 0 : index
    %3 = vector.load %arg3[%c0_3, %c0_4] : memref<1x128xf32, #tpu.memory_space<vmem>>, vector<1x128xf32>
    %4 = vector.broadcast %3 : vector<1x128xf32> to vector<256x128xf32>
    %5 = arith.addf %2, %4 : vector<256x128xf32>
    %cst_5 = arith.constant 0.000000e+00 : f32
    %6 = vector.broadcast %cst_5 : f32 to vector<256x128xf32>
    %7 = arith.maximumf %5, %6 : vector<256x128xf32>
    %c0_6 = arith.constant 0 : index
    %c0_7 = arith.constant 0 : index
    %8 = vector.load %arg4[%c0_6, %c0_7] : memref<128x128xf32, #tpu.memory_space<vmem>>, vector<128x128xf32>
    %cst_8 = arith.constant dense<0.000000e+00> : vector<256x128xf32>
    %9 = tpu.matmul %7, %8, %cst_8 {dimension_numbers = #tpu.dot_dimension_numbers<[1], [0], [0], [1], [0, 0, 1, 1], [], []>} : vector<256x128xf32>, vector<128x128xf32>, vector<256x128xf32> -> vector<256x128xf32>
    %c0_9 = arith.constant 0 : index
    %c0_10 = arith.constant 0 : index
    %10 = vector.load %arg5[%c0_9, %c0_10] : memref<1x128xf32, #tpu.memory_space<vmem>>, vector<1x128xf32>
    %11 = vector.broadcast %10 : vector<1x128xf32> to vector<256x128xf32>
    %12 = arith.addf %9, %11 : vector<256x128xf32>
    %cst_11 = arith.constant 0.000000e+00 : f32
    %13 = vector.broadcast %cst_11 : f32 to vector<256x128xf32>
    %14 = arith.maximumf %12, %13 : vector<256x128xf32>
    %c0_12 = arith.constant 0 : index
    %c0_13 = arith.constant 0 : index
    %15 = vector.load %arg6[%c0_12, %c0_13] : memref<128x128xf32, #tpu.memory_space<vmem>>, vector<128x128xf32>
    %cst_14 = arith.constant dense<0.000000e+00> : vector<256x128xf32>
    %16 = tpu.matmul %14, %15, %cst_14 {dimension_numbers = #tpu.dot_dimension_numbers<[1], [0], [0], [1], [0, 0, 1, 1], [], []>} : vector<256x128xf32>, vector<128x128xf32>, vector<256x128xf32> -> vector<256x128xf32>
    %c0_15 = arith.constant 0 : index
    %c0_16 = arith.constant 0 : index
    %17 = vector.load %arg7[%c0_15, %c0_16] : memref<1x128xf32, #tpu.memory_space<vmem>>, vector<1x128xf32>
    %18 = vector.broadcast %17 : vector<1x128xf32> to vector<256x128xf32>
    %19 = arith.addf %16, %18 : vector<256x128xf32>
    %cst_17 = arith.constant dense<0xFF800000> : vector<256xf32>
    %20 = vector.multi_reduction <maximumf>, %19, %cst_17 [1] : vector<256x128xf32> to vector<256xf32>
    %21 = vector.shape_cast %20 : vector<256xf32> to vector<256x1xf32>
    %22 = vector.broadcast %21 : vector<256x1xf32> to vector<256x128xf32>
    %23 = arith.subf %19, %22 : vector<256x128xf32>
    %24 = math.exp %23 : vector<256x128xf32>
    %cst_18 = arith.constant dense<0.000000e+00> : vector<256xf32>
    %25 = vector.multi_reduction <add>, %24, %cst_18 [1] : vector<256x128xf32> to vector<256xf32>
    %26 = vector.shape_cast %25 : vector<256xf32> to vector<256x1xf32>
    %27 = tpu.reciprocal %26 {approx = true} : vector<256x1xf32> -> vector<256x1xf32>
    %28 = vector.broadcast %27 : vector<256x1xf32> to vector<256x128xf32>
    %29 = arith.mulf %24, %28 : vector<256x128xf32>
    %c0_19 = arith.constant 0 : index
    %c0_20 = arith.constant 0 : index
    %30 = vector.load %arg8[%c0_19, %c0_20] : memref<256x128xf32, #tpu.memory_space<vmem>>, vector<256x128xf32>
    tpu.vector_store %arg8[%c0_19, %c0_20], %29 {strides = array<i32>} : memref<256x128xf32, #tpu.memory_space<vmem>>, vector<256x128xf32>,
    return
  }
  func.func @transform_0(%arg0: i32) -> (i32, i32) {
    %c0_i32 = arith.constant 0 : i32
    %c0_i32_0 = arith.constant 0 : i32
    return %arg0, %c0_i32 : i32, i32
  }
  func.func @transform_1(%arg0: i32) -> (i32, i32) {
    %c0_i32 = arith.constant 0 : i32
    %c0_i32_0 = arith.constant 0 : i32
    %c0_i32_1 = arith.constant 0 : i32
    return %c0_i32, %c0_i32_0 : i32, i32
  }
  func.func @transform_2(%arg0: i32) -> (i32, i32) {
    %c0_i32 = arith.constant 0 : i32
    %c0_i32_0 = arith.constant 0 : i32
    %c0_i32_1 = arith.constant 0 : i32
    return %c0_i32, %c0_i32_0 : i32, i32
  }
  func.func @transform_3(%arg0: i32) -> (i32, i32) {
    %c0_i32 = arith.constant 0 : i32
    %c0_i32_0 = arith.constant 0 : i32
    %c0_i32_1 = arith.constant 0 : i32
    return %c0_i32, %c0_i32_0 : i32, i32
  }
  func.func @transform_4(%arg0: i32) -> (i32, i32) {
    %c0_i32 = arith.constant 0 : i32
    %c0_i32_0 = arith.constant 0 : i32
    %c0_i32_1 = arith.constant 0 : i32
    return %c0_i32, %c0_i32_0 : i32, i32
  }
  func.func @transform_5(%arg0: i32) -> (i32, i32) {
    %c0_i32 = arith.constant 0 : i32
    %c0_i32_0 = arith.constant 0 : i32
    %c0_i32_1 = arith.constant 0 : i32
    return %c0_i32, %c0_i32_0 : i32, i32
  }
  func.func @transform_6(%arg0: i32) -> (i32, i32) {
    %c0_i32 = arith.constant 0 : i32
    %c0_i32_0 = arith.constant 0 : i32
    %c0_i32_1 = arith.constant 0 : i32
    return %c0_i32, %c0_i32_0 : i32, i32
  }
  func.func @transform_7(%arg0: i32) -> (i32, i32) {
    %c0_i32 = arith.constant 0 : i32
    %c0_i32_0 = arith.constant 0 : i32
    return %arg0, %c0_i32 : i32, i32
  }
}

</mosaic_0001>

<bundles_post_ra>
// kernel: portfolio_optimizer_forward.1
= control target key start
LH: loop header
LB: loop body
LE: loop exit
PB: predicated region body
PF: predicated region fallthrough
CT: control target
= control target key end

     0   :  { %vm63_vm0 = vcmask 64512   ;;  %s1853_s1 = inlined_call_operand.vmem [shape: f32[8,128], index: 1, kind: input, shape index: {}]   ;;  %s1854_s0 = inlined_call_operand.vmem [shape: f32[256,8], index: 0, kind: input, shape index: {}]   ;;  %s1855_s2 = inlined_call_operand.vmem [shape: f32[1,128], index: 2, kind: input, shape index: {}]   ;;  %s1856_s3 = inlined_call_operand.vmem [shape: f32[128,128], index: 3, kind: input, shape index: {}]   ;;  %s1857_s4 = inlined_call_operand.vmem [shape: f32[1,128], index: 4, kind: input, shape index: {}]   ;;  %s1858_s5 = inlined_call_operand.vmem [shape: f32[128,128], index: 5, kind: input, shape index: {}]   ;;  %s1859_s6 = inlined_call_operand.vmem [shape: f32[1,128], index: 6, kind: input, shape index: {}]   ;;  %s1860_s7 = inlined_call_operand.vmem [shape: f32[256,128], index: 7, kind: output, shape index: {}]  }
   0x1   :  { %v58_v0 = vld [vmem:[%s1853_s1] sm:$0xff]  ;;  %v27_v2 = vld [vmem:[%s1854_s0 + $0x8] sm:$0xff]  ;;  %v28_v3 = vld [vmem:[%s1854_s0 + $0x10] sm:$0xff] }
   0x2   :  { %v26_v1 = vld [vmem:[%s1854_s0] sm:$0xff]  ;;  %175 = vmatpush.msra.mxu0 %v58_v0  ;;  %959 = vmatpush.msra.mxu3 %v58_v0  ;;  %v29_v4 = vld [vmem:[%s1854_s0 + $0x18] sm:$0xff]  ;;  %v31_v6 = vld [vmem:[%s1854_s0 + $0x28] sm:$0xff] }
   0x3   :  { %927 = vmatmul.msk.f32.vlgmr.msra.gmra.mxu0 %vm63_vm0, %v26_v1  ;;  %v30_v5 = vld [vmem:[%s1854_s0 + $0x20] sm:$0xff]  ;;  %v32_v7 = vld [vmem:[%s1854_s0 + $0x30] sm:$0xff]  ;;  %v33_v8 = vld [vmem:[%s1854_s0 + $0x38] sm:$0xff] }
   0x4   :  { %v34_v9 = vld [vmem:[%s1854_s0 + $0x40] sm:$0xff]  ;;  %v320_v10 = vld [vmem:[%s1856_s3 + $0x78] sm:$0xff]  ;;  %v319_v11 = vld [vmem:[%s1856_s3 + $0x70] sm:$0xff] }
   0x5   :  { %325 = vmatpush.msra.mxu1 %v320_v10  ;;  %960 = vmatpush.msrb.mxu3 %v320_v10  ;;  %v318_v12 = vld [vmem:[%s1856_s3 + $0x68] sm:$0xff]  ;;  %v317_v14 = vld [vmem:[%s1856_s3 + $0x60] sm:$0xff]  ;;  %v316_v15 = vld [vmem:[%s1856_s3 + $0x58] sm:$0xff] }
   0x6   :  { %v35_v13 = vld [vmem:[%s1854_s0 + $0x48] sm:$0xff]  ;;  %v315_v16 = vld [vmem:[%s1856_s3 + $0x50] sm:$0xff]  ;;  %v313_v19 = vld [vmem:[%s1856_s3 + $0x40] sm:$0xff] }
   0x7   :  { %326 = vmatpush.msra.mxu1 %v319_v11  ;;  %961 = vmatpush.msrb.mxu3 %v319_v11  ;;  %v314_v17 = vld [vmem:[%s1856_s3 + $0x48] sm:$0xff]  ;;  %v36_v18 = vld [vmem:[%s1854_s0 + $0x50] sm:$0xff]  ;;  %v312_v20 = vld [vmem:[%s1856_s3 + $0x38] sm:$0xff] }
   0x8   :  { %v311_v21 = vld [vmem:[%s1856_s3 + $0x30] sm:$0xff]  ;;  %v310_v22 = vld [vmem:[%s1856_s3 + $0x28] sm:$0xff]  ;;  %v37_v23 = vld [vmem:[%s1854_s0 + $0x58] sm:$0xff] }
   0x9   :  { %327 = vmatpush.msra.mxu1 %v318_v12  ;;  %962 = vmatpush.msrb.mxu3 %v318_v12  ;;  %v309_v24 = vld [vmem:[%s1856_s3 + $0x20] sm:$0xff]  ;;  %v308_v25 = vld [vmem:[%s1856_s3 + $0x18] sm:$0xff]  ;;  %v307_v26 = vld [vmem:[%s1856_s3 + $0x10] sm:$0xff] }
   0xa   :  { %v38_v27 = vld [vmem:[%s1854_s0 + $0x60] sm:$0xff]  ;;  %v306_v28 = vld [vmem:[%s1856_s3 + $0x8] sm:$0xff]  ;;  %v40_v31 = vld [vmem:[%s1854_s0 + $0x70] sm:$0xff] }
   0xb   :  { %928 = vmatmul.msk.f32.gmra.mxu0 %vm63_vm0, %v27_v2  ;;  %328 = vmatpush.msra.mxu1 %v317_v14  ;;  %v305_v29 = vld [vmem:[%s1856_s3] sm:$0xff]  ;;  %v39_v30 = vld [vmem:[%s1854_s0 + $0x68] sm:$0xff]  ;;  %v41_v32 = vld [vmem:[%s1854_s0 + $0x78] sm:$0xff] }
   0xc   :  { %963 = vmatpush.msrb.mxu3 %v317_v14  ;;  %v1281_v33 = vld [vmem:[%s1855_s2] ss:$0 sm:$0xff]  ;;  %v43_v39 = vld [vmem:[%s1854_s0 + $0x88] sm:$0xff]  ;;  %v44_v43 = vld [vmem:[%s1854_s0 + $0x90] sm:$0xff] }
   0xd   :  { %329 = vmatpush.msra.mxu1 %v316_v15  ;;  %v42_v35 = vld [vmem:[%s1854_s0 + $0x80] sm:$0xff]  ;;  %v45_v47 = vld [vmem:[%s1854_s0 + $0x98] sm:$0xff]  ;;  %v47_v55 = vld [vmem:[%s1854_s0 + $0xa8] sm:$0xff] }
   0xe   :  { %964 = vmatpush.msrb.mxu3 %v316_v15  ;;  %v46_v51 = vld [vmem:[%s1854_s0 + $0xa0] sm:$0xff]  ;;  %v52_v58 = vld [vmem:[%s1854_s0 + $0xd0] sm:$0xff]  ;;  %v53_v63 = vld [vmem:[%s1854_s0 + $0xd8] sm:$0xff] }
   0xf   :  { %330 = vmatpush.msra.mxu1 %v315_v16  ;;  %953 = vmatmul.msk.f32.vlgmr.msra.gmra.mxu3 %vm63_vm0, %v52_v58  ;;  %v48_v60 = vld [vmem:[%s1854_s0 + $0xb0] sm:$0xff]  ;;  %v49_v1 = vld [vmem:[%s1854_s0 + $0xb8] sm:$0xff]  ;;  %v51_v12 = vld [vmem:[%s1854_s0 + $0xc8] sm:$0xff] }
  0x10   :  { %965 = vmatpush.msrb.mxu3 %v315_v16  ;;  %v485_v10 = vld [vmem:[%s1858_s5 + $0x78] sm:$0xff]  ;;  %v484_v14 = vld [vmem:[%s1858_s5 + $0x70] sm:$0xff]  ;;  %v483_v16 = vld [vmem:[%s1858_s5 + $0x68] sm:$0xff] }
  0x11   :  { %331 = vmatpush.msra.mxu1 %v314_v17  ;;  %490 = vmatpush.msra.mxu2 %v485_v10 }
  0x12   :  { %966 = vmatpush.msrb.mxu3 %v314_v17  ;;  %v56_v17 = vld [vmem:[%s1854_s0 + $0xf0] sm:$0xff] }
  0x13   :  { %929 = vmatmul.msk.f32.gmra.mxu0 %vm63_vm0, %v28_v3  ;;  %332 = vmatpush.msra.mxu1 %v313_v19 }
  0x14   :  { %967 = vmatpush.msrb.mxu3 %v313_v19  ;;  %491 = vmatpush.msra.mxu2 %v484_v14  ;;  %v481_v19 = vld [vmem:[%s1858_s5 + $0x58] sm:$0xff] }
  0x15   :  { %333 = vmatpush.msra.mxu1 %v312_v20 }
  0x16   :  { %968 = vmatpush.msrb.mxu3 %v312_v20  ;;  %492 = vmatpush.msra.mxu2 %v483_v16 }
  0x17   :  { %334 = vmatpush.msra.mxu1 %v311_v21  ;;  %954 = vmatmul.msk.f32.gmra.mxu3 %vm63_vm0, %v53_v63 }
  0x18   :  { %969 = vmatpush.msrb.mxu3 %v311_v21 }
  0x19   :  { %335 = vmatpush.msra.mxu1 %v310_v22 }
  0x1a   :  { %970 = vmatpush.msrb.mxu3 %v310_v22  ;;  %v480_v22 = vld [vmem:[%s1858_s5 + $0x50] sm:$0xff] }
  0x1b   :  { %930 = vmatmul.msk.f32.gmra.mxu0 %vm63_vm0, %v29_v4  ;;  %336 = vmatpush.msra.mxu1 %v309_v24  ;;  %v54_v4 = vld [vmem:[%s1854_s0 + $0xe0] sm:$0xff] }
  0x1c   :  { %971 = vmatpush.msrb.mxu3 %v309_v24  ;;  %v479_v24 = vld [vmem:[%s1858_s5 + $0x48] sm:$0xff] }
  0x1d   :  { %337 = vmatpush.msra.mxu1 %v308_v25 }
  0x1e   :  { %972 = vmatpush.msrb.mxu3 %v308_v25  ;;  %v57_v25 = vld [vmem:[%s1854_s0 + $0xf8] sm:$0xff] }
  0x1f   :  { %338 = vmatpush.msra.mxu1 %v307_v26  ;;  %955 = vmatmul.msk.f32.gmra.mxu3 %vm63_vm0, %v54_v4 }
  0x20   :  { %973 = vmatpush.msrb.mxu3 %v307_v26  ;;  %v478_v26 = vld [vmem:[%s1858_s5 + $0x40] sm:$0xff] }
  0x21   :  { %339 = vmatpush.msra.mxu1 %v306_v28 }
  0x22   :  { %974 = vmatpush.msrb.mxu3 %v306_v28 }
  0x23   :  { %931 = vmatmul.msk.f32.gmra.mxu0 %vm63_vm0, %v30_v5  ;;  %340 = vmatpush.msra.mxu1 %v305_v29 }
  0x24   :  { %975 = vmatpush.msrb.mxu3 %v305_v29 }
  0x26   :  { %976 = vmatpush.msra.mxu3 %v485_v10 }
  0x28   :  { %977 = vmatpush.msra.mxu3 %v484_v14 }
  0x2a   :  { %978 = vmatpush.msra.mxu3 %v483_v16 }
  0x2b   :  { %932 = vmatmul.msk.f32.gmra.mxu0 %vm63_vm0, %v31_v6  ;;  %v50_v6 = vld [vmem:[%s1854_s0 + $0xc0] sm:$0xff] }
  0x33   :  { %933 = vmatmul.msk.f32.gmra.mxu0 %vm63_vm0, %v32_v7 }
  0x3b   :  { %934 = vmatmul.msk.f32.gmra.mxu0 %vm63_vm0, %v33_v8 }
  0x43   :  { %935 = vmatmul.msk.f32.gmra.mxu0 %vm63_vm0, %v34_v9  ;;  %v55_v9 = vld [vmem:[%s1854_s0 + $0xe8] sm:$0xff] }
  0x44   :  { %956 = vmatmul.msk.f32.gmra.mxu3 %vm63_vm0, %v55_v9 }
  0x4b   :  { %936 = vmatmul.msk.f32.gmra.mxu0 %vm63_vm0, %v35_v13 }
  0x4c   :  { %957 = vmatmul.msk.f32.gmra.mxu3 %vm63_vm0, %v56_v17 }
  0x53   :  { %937 = vmatmul.msk.f32.gmra.mxu0 %vm63_vm0, %v36_v18  ;;  %v482_v18 = vld [vmem:[%s1858_s5 + $0x60] sm:$0xff] }
  0x54   :  { %493 = vmatpush.msra.mxu2 %v482_v18  ;;  %979 = vmatpush.msra.mxu3 %v482_v18 }
  0x55   :  { %958 = vmatmul.msk.f32.gmra.mxu3 %vm63_vm0, %v57_v25 }
  0x56   :  { %494 = vmatpush.msra.mxu2 %v481_v19  ;;  %980 = vmatpush.msra.mxu3 %v481_v19 }
  0x58   :  { %495 = vmatpush.msra.mxu2 %v480_v22  ;;  %981 = vmatpush.msra.mxu3 %v480_v22 }
  0x5a   :  { %496 = vmatpush.msra.mxu2 %v479_v24  ;;  %982 = vmatpush.msra.mxu3 %v479_v24 }
  0x5b   :  { %938 = vmatmul.msk.f32.gmra.mxu0 %vm63_vm0, %v37_v23 }
  0x5c   :  { %497 = vmatpush.msra.mxu2 %v478_v26  ;;  %983 = vmatpush.msra.mxu3 %v478_v26 }
  0x63   :  { %939 = vmatmul.msk.f32.gmra.mxu0 %vm63_vm0, %v38_v27  ;;  %v477_v27 = vld [vmem:[%s1858_s5 + $0x38] sm:$0xff] }
  0x64   :  { %498 = vmatpush.msra.mxu2 %v477_v27  ;;  %984 = vmatpush.msra.mxu3 %v477_v27 }
  0x6b   :  { %940 = vmatmul.msk.f32.gmra.mxu0 %vm63_vm0, %v39_v30  ;;  %v476_v30 = vld [vmem:[%s1858_s5 + $0x30] sm:$0xff] }
  0x6c   :  { %499 = vmatpush.msra.mxu2 %v476_v30  ;;  %985 = vmatpush.msra.mxu3 %v476_v30 }
  0x73   :  { %941 = vmatmul.msk.f32.gmra.mxu0 %vm63_vm0, %v40_v31 }
  0x7b   :  { %942 = vmatmul.msk.f32.gmra.mxu0 %vm63_vm0, %v41_v32  ;;  %v475_v32 = vld [vmem:[%s1858_s5 + $0x28] sm:$0xff] }
  0x7c   :  { %500 = vmatpush.msra.mxu2 %v475_v32  ;;  %986 = vmatpush.msra.mxu3 %v475_v32 }
  0x80   :  { %v177_v34 = vpop.f32.mrf.mxu0 }
  0x81   :  { %v178_v36 = vadd.f32 %v1281_v33, %v177_v34  ;;  %v474_v34 = vld [vmem:[%s1858_s5 + $0x20] sm:$0xff] }
  0x82   :  { %501 = vmatpush.msra.mxu2 %v474_v34  ;;  %987 = vmatpush.msra.mxu3 %v474_v34 }
  0x83   :  { %943 = vmatmul.msk.f32.gmra.mxu0 %vm63_vm0, %v42_v35  ;;  %v273_v37 = vmax.f32 %v178_v36, 0.0  ;;  %v473_v35 = vld [vmem:[%s1858_s5 + $0x18] sm:$0xff] }
  0x84   :  { %502 = vmatpush.msra.mxu2 %v473_v35  ;;  %988 = vmatpush.msra.mxu3 %v473_v35 }
  0x85   :  { %341 = vmatmul.f32.vlgmr.msra.gmra.mxu1 %v273_v37 }
  0x88   :  { %v180_v38 = vpop.f32.mrf.mxu0 }
  0x89   :  { %v181_v40 = vadd.f32 %v1281_v33, %v180_v38  ;;  %v472_v38 = vld [vmem:[%s1858_s5 + $0x10] sm:$0xff] }
  0x8a   :  { %503 = vmatpush.msra.mxu2 %v472_v38  ;;  %989 = vmatpush.msra.mxu3 %v472_v38 }
  0x8b   :  { %944 = vmatmul.msk.f32.gmra.mxu0 %vm63_vm0, %v43_v39  ;;  %v274_v41 = vmax.f32 %v181_v40, 0.0  ;;  %v471_v40 = vld [vmem:[%s1858_s5 + $0x8] sm:$0xff] }
  0x8c   :  { %504 = vmatpush.msra.mxu2 %v471_v40  ;;  %990 = vmatpush.msra.mxu3 %v471_v40 }
  0x8d   :  { %344 = vmatmul.f32.gmra.mxu1 %v274_v41  ;;  %v470_v41 = vld [vmem:[%s1858_s5] sm:$0xff] }
  0x8e   :  { %505 = vmatpush.msra.mxu2 %v470_v41  ;;  %991 = vmatpush.msra.mxu3 %v470_v41 }
  0x90   :  { %v183_v42 = vpop.f32.mrf.mxu0 }
  0x91   :  { %v184_v44 = vadd.f32 %v1281_v33, %v183_v42 }
  0x92   :  { %v255_v38 = vpop.f32.mrf.mxu3 }
  0x93   :  { %v275_v45 = vmax.f32 %v184_v44, 0.0  ;;  %945 = vmatmul.msk.f32.gmra.mxu0 %vm63_vm0, %v44_v43 }
  0x95   :  { %347 = vmatmul.f32.gmra.mxu1 %v275_v45 }
  0x98   :  { %v186_v46 = vpop.f32.mrf.mxu0 }
  0x99   :  { %v187_v48 = vadd.f32 %v1281_v33, %v186_v46 }
  0x9b   :  { %v276_v49 = vmax.f32 %v187_v48, 0.0  ;;  %946 = vmatmul.msk.f32.gmra.mxu0 %vm63_vm0, %v45_v47 }
  0x9d   :  { %350 = vmatmul.f32.gmra.mxu1 %v276_v49 }
  0xa0   :  { %v189_v50 = vpop.f32.mrf.mxu0 }
  0xa1   :  { %v190_v52 = vadd.f32 %v1281_v33, %v189_v50 }
  0xa3   :  { %v277_v53 = vmax.f32 %v190_v52, 0.0  ;;  %947 = vmatmul.msk.f32.gmra.mxu0 %vm63_vm0, %v46_v51  ;;  %v1414_v51 = vld [vmem:[%s1857_s4] ss:$0 sm:$0xff] }
  0xa5   :  { %353 = vmatmul.f32.gmra.mxu1 %v277_v53 }
  0xa8   :  { %v192_v54 = vpop.f32.mrf.mxu0 }
  0xa9   :  { %v193_v56 = vadd.f32 %v1281_v33, %v192_v54 }
  0xab   :  { %v278_v57 = vmax.f32 %v193_v56, 0.0  ;;  %948 = vmatmul.msk.f32.gmra.mxu0 %vm63_vm0, %v47_v55 }
  0xad   :  { %356 = vmatmul.f32.gmra.mxu1 %v278_v57 }
  0xb0   :  { %v195_v59 = vpop.f32.mrf.mxu0 }
  0xb1   :  { %v196_v61 = vadd.f32 %v1281_v33, %v195_v59 }
  0xb3   :  { %v279_v62 = vmax.f32 %v196_v61, 0.0  ;;  %949 = vmatmul.msk.f32.gmra.mxu0 %vm63_vm0, %v48_v60 }
  0xb5   :  { %359 = vmatmul.f32.gmra.mxu1 %v279_v62 }
  0xb8   :  { %v198_v0 = vpop.f32.mrf.mxu0 }
  0xb9   :  { %v199_v2 = vadd.f32 %v1281_v33, %v198_v0 }
  0xbb   :  { %v280_v3 = vmax.f32 %v199_v2, 0.0  ;;  %950 = vmatmul.msk.f32.gmra.mxu0 %vm63_vm0, %v49_v1 }
  0xbd   :  { %362 = vmatmul.f32.gmra.mxu1 %v280_v3 }
  0xc0   :  { %v201_v5 = vpop.f32.mrf.mxu0 }
  0xc1   :  { %v202_v7 = vadd.f32 %v1281_v33, %v201_v5 }
  0xc3   :  { %v281_v8 = vmax.f32 %v202_v7, 0.0  ;;  %951 = vmatmul.msk.f32.gmra.mxu0 %vm63_vm0, %v50_v6 }
  0xc5   :  { %365 = vmatmul.f32.gmra.mxu1 %v281_v8 }
  0xc8   :  { %v204_v11 = vpop.f32.mrf.mxu0 }
  0xc9   :  { %v205_v13 = vadd.f32 %v1281_v33, %v204_v11 }
  0xcb   :  { %v282_v15 = vmax.f32 %v205_v13, 0.0  ;;  %952 = vmatmul.msk.f32.gmra.mxu0 %vm63_vm0, %v51_v12 }
  0xcd   :  { %368 = vmatmul.f32.gmra.mxu1 %v282_v15 }
  0xd0   :  { %v207_v20 = vpop.f32.mrf.mxu0 }
  0xd1   :  { %v208_v21 = vadd.f32 %v1281_v33, %v207_v20 }
  0xd3   :  { %v283_v23 = vmax.f32 %v208_v21, 0.0 }
  0xd5   :  { %371 = vmatmul.f32.gmra.mxu1 %v283_v23 }
  0xd8   :  { %v210_v28 = vpop.f32.mrf.mxu0 }
  0xd9   :  { %v211_v29 = vadd.f32 %v1281_v33, %v210_v28 }
  0xdb   :  { %v284_v31 = vmax.f32 %v211_v29, 0.0 }
  0xdd   :  { %374 = vmatmul.f32.gmra.mxu1 %v284_v31 }
  0xe0   :  { %v213_v36 = vpop.f32.mrf.mxu0 }
  0xe1   :  { %v214_v37 = vadd.f32 %v1281_v33, %v213_v36 }
  0xe3   :  { %v285_v39 = vmax.f32 %v214_v37, 0.0 }
  0xe5   :  { %377 = vmatmul.f32.gmra.mxu1 %v285_v39 }
  0xe8   :  { %v216_v42 = vpop.f32.mrf.mxu0 }
  0xe9   :  { %v217_v43 = vadd.f32 %v1281_v33, %v216_v42 }
  0xeb   :  { %v286_v44 = vmax.f32 %v217_v43, 0.0 }
  0xed   :  { %380 = vmatmul.f32.gmra.mxu1 %v286_v44 }
  0xf0   :  { %v219_v45 = vpop.f32.mrf.mxu0 }
  0xf1   :  { %v220_v46 = vadd.f32 %v1281_v33, %v219_v45 }
  0xf3   :  { %v287_v47 = vmax.f32 %v220_v46, 0.0 }
  0xf5   :  { %383 = vmatmul.f32.gmra.mxu1 %v287_v47  ;;  %v258_v47 = vpop.f32.mrf.mxu3 }
  0xf8   :  { %v222_v48 = vpop.f32.mrf.mxu0 }
  0xf9   :  { %v223_v49 = vadd.f32 %v1281_v33, %v222_v48 }
  0xfb   :  { %v288_v50 = vmax.f32 %v223_v49, 0.0 }
  0xfd   :  { %386 = vmatmul.f32.gmra.mxu1 %v288_v50 }
 0x100   :  { %v225_v52 = vpop.f32.mrf.mxu0 }
 0x101   :  { %v226_v53 = vadd.f32 %v1281_v33, %v225_v52  ;;  %v256_v52 = vadd.f32 %v1281_v33, %v255_v38 }
 0x102   :  { %v342_v54 = vpop.f32.mrf.mxu1 }
 0x103   :  { %v289_v55 = vmax.f32 %v226_v53, 0.0  ;;  %v343_v56 = vadd.f32 %v1414_v51, %v342_v54  ;;  %v299_v53 = vmax.f32 %v256_v52, 0.0 }
 0x105   :  { %v438_v57 = vmax.f32 %v343_v56, 0.0  ;;  %389 = vmatmul.f32.gmra.mxu1 %v289_v55  ;;  %v261_v56 = vpop.f32.mrf.mxu3 }
 0x107   :  { %506 = vmatmul.f32.vlgmr.msra.gmra.mxu2 %v438_v57 }
 0x108   :  { %v228_v58 = vpop.f32.mrf.mxu0 }
 0x109   :  { %v229_v59 = vadd.f32 %v1281_v33, %v228_v58  ;;  %v259_v58 = vadd.f32 %v1281_v33, %v258_v47 }
 0x10a   :  { %v345_v60 = vpop.f32.mrf.mxu1 }
 0x10b   :  { %v290_v61 = vmax.f32 %v229_v59, 0.0  ;;  %v346_v62 = vadd.f32 %v1414_v51, %v345_v60  ;;  %v300_v59 = vmax.f32 %v259_v58, 0.0 }
 0x10d   :  { %v439_v63 = vmax.f32 %v346_v62, 0.0  ;;  %392 = vmatmul.f32.gmra.mxu1 %v290_v61 }
 0x10f   :  { %509 = vmatmul.f32.gmra.mxu2 %v439_v63  ;;  %v262_v63 = vadd.f32 %v1281_v33, %v261_v56 }
 0x110   :  { %v231_v0 = vpop.f32.mrf.mxu0 }
 0x111   :  { %v232_v1 = vadd.f32 %v1281_v33, %v231_v0  ;;  %v264_v0 = vpop.f32.mrf.mxu3 }
 0x112   :  { %v348_v2 = vpop.f32.mrf.mxu1 }
 0x113   :  { %v291_v3 = vmax.f32 %v232_v1, 0.0  ;;  %v349_v4 = vadd.f32 %v1414_v51, %v348_v2  ;;  %v301_v1 = vmax.f32 %v262_v63, 0.0 }
 0x115   :  { %v440_v5 = vmax.f32 %v349_v4, 0.0  ;;  %395 = vmatmul.f32.gmra.mxu1 %v291_v3 }
 0x117   :  { %512 = vmatmul.f32.gmra.mxu2 %v440_v5  ;;  %v265_v5 = vadd.f32 %v1281_v33, %v264_v0 }
 0x118   :  { %v234_v6 = vpop.f32.mrf.mxu0 }
 0x119   :  { %v235_v7 = vadd.f32 %v1281_v33, %v234_v6  ;;  %v267_v6 = vpop.f32.mrf.mxu3 }
 0x11a   :  { %v351_v8 = vpop.f32.mrf.mxu1 }
 0x11b   :  { %v292_v9 = vmax.f32 %v235_v7, 0.0  ;;  %v352_v10 = vadd.f32 %v1414_v51, %v351_v8  ;;  %v302_v7 = vmax.f32 %v265_v5, 0.0 }
 0x11d   :  { %v441_v11 = vmax.f32 %v352_v10, 0.0  ;;  %398 = vmatmul.f32.gmra.mxu1 %v292_v9 }
 0x11f   :  { %515 = vmatmul.f32.gmra.mxu2 %v441_v11  ;;  %v268_v11 = vadd.f32 %v1281_v33, %v267_v6 }
 0x120   :  { %v237_v12 = vpop.f32.mrf.mxu0 }
 0x121   :  { %v238_v13 = vadd.f32 %v1281_v33, %v237_v12  ;;  %v303_v12 = vmax.f32 %v268_v11, 0.0 }
 0x122   :  { %v354_v14 = vpop.f32.mrf.mxu1 }
 0x123   :  { %v293_v15 = vmax.f32 %v238_v13, 0.0  ;;  %v355_v16 = vadd.f32 %v1414_v51, %v354_v14  ;;  %v270_v14 = vpop.f32.mrf.mxu3 }
 0x125   :  { %v442_v17 = vmax.f32 %v355_v16, 0.0  ;;  %401 = vmatmul.f32.gmra.mxu1 %v293_v15 }
 0x127   :  { %518 = vmatmul.f32.gmra.mxu2 %v442_v17  ;;  %v271_v17 = vadd.f32 %v1281_v33, %v270_v14 }
 0x128   :  { %v240_v18 = vpop.f32.mrf.mxu0 }
 0x129   :  { %v241_v19 = vadd.f32 %v1281_v33, %v240_v18  ;;  %v304_v18 = vmax.f32 %v271_v17, 0.0 }
 0x12a   :  { %v357_v20 = vpop.f32.mrf.mxu1 }
 0x12b   :  { %v294_v21 = vmax.f32 %v241_v19, 0.0  ;;  %v358_v22 = vadd.f32 %v1414_v51, %v357_v20 }
 0x12d   :  { %v443_v23 = vmax.f32 %v358_v22, 0.0  ;;  %404 = vmatmul.f32.gmra.mxu1 %v294_v21 }
 0x12f   :  { %521 = vmatmul.f32.gmra.mxu2 %v443_v23 }
 0x130   :  { %v243_v24 = vpop.f32.mrf.mxu0 }
 0x131   :  { %v244_v25 = vadd.f32 %v1281_v33, %v243_v24 }
 0x132   :  { %v360_v26 = vpop.f32.mrf.mxu1 }
 0x133   :  { %v295_v27 = vmax.f32 %v244_v25, 0.0  ;;  %v361_v28 = vadd.f32 %v1414_v51, %v360_v26  ;;  %v1452_v25 = vld [vmem:[%s1859_s6] ss:$0 sm:$0xff] }
 0x135   :  { %v444_v29 = vmax.f32 %v361_v28, 0.0  ;;  %407 = vmatmul.f32.gmra.mxu1 %v295_v27 }
 0x137   :  { %524 = vmatmul.f32.gmra.mxu2 %v444_v29 }
 0x138   :  { %v246_v30 = vpop.f32.mrf.mxu0 }
 0x139   :  { %v247_v31 = vadd.f32 %v1281_v33, %v246_v30 }
 0x13a   :  { %v363_v32 = vpop.f32.mrf.mxu1 }
 0x13b   :  { %v296_v34 = vmax.f32 %v247_v31, 0.0  ;;  %v364_v35 = vadd.f32 %v1414_v51, %v363_v32 }
 0x13d   :  { %v445_v36 = vmax.f32 %v364_v35, 0.0  ;;  %410 = vmatmul.f32.vlgmr.msrb.gmra.mxu3 %v296_v34 }
 0x13f   :  { %527 = vmatmul.f32.gmra.mxu2 %v445_v36 }
 0x140   :  { %v249_v37 = vpop.f32.mrf.mxu0 }
 0x141   :  { %v250_v39 = vadd.f32 %v1281_v33, %v249_v37 }
 0x142   :  { %v366_v40 = vpop.f32.mrf.mxu1 }
 0x143   :  { %v297_v41 = vmax.f32 %v250_v39, 0.0  ;;  %v367_v42 = vadd.f32 %v1414_v51, %v366_v40 }
 0x145   :  { %v446_v43 = vmax.f32 %v367_v42, 0.0  ;;  %413 = vmatmul.f32.gmra.mxu3 %v297_v41 }
 0x147   :  { %530 = vmatmul.f32.gmra.mxu2 %v446_v43 }
 0x148   :  { %v252_v44 = vpop.f32.mrf.mxu0 }
 0x149   :  { %v253_v45 = vadd.f32 %v1281_v33, %v252_v44 }
 0x14a   :  { %v369_v46 = vpop.f32.mrf.mxu1 }
 0x14b   :  { %v298_v48 = vmax.f32 %v253_v45, 0.0  ;;  %v370_v49 = vadd.f32 %v1414_v51, %v369_v46 }
 0x14d   :  { %v447_v50 = vmax.f32 %v370_v49, 0.0  ;;  %416 = vmatmul.f32.gmra.mxu3 %v298_v48 }
 0x14f   :  { %533 = vmatmul.f32.gmra.mxu2 %v447_v50 }
 0x152   :  { %v372_v54 = vpop.f32.mrf.mxu1 }
 0x153   :  { %v373_v55 = vadd.f32 %v1414_v51, %v372_v54 }
 0x155   :  { %v448_v57 = vmax.f32 %v373_v55, 0.0  ;;  %419 = vmatmul.f32.gmra.mxu3 %v299_v53 }
 0x157   :  { %536 = vmatmul.f32.gmra.mxu2 %v448_v57 }
 0x15a   :  { %v375_v60 = vpop.f32.mrf.mxu1 }
 0x15b   :  { %v376_v61 = vadd.f32 %v1414_v51, %v375_v60 }
 0x15d   :  { %v449_v62 = vmax.f32 %v376_v61, 0.0  ;;  %422 = vmatmul.f32.gmra.mxu3 %v300_v59 }
 0x15f   :  { %539 = vmatmul.f32.gmra.mxu2 %v449_v62 }
 0x162   :  { %v378_v2 = vpop.f32.mrf.mxu1 }
 0x163   :  { %v379_v3 = vadd.f32 %v1414_v51, %v378_v2 }
 0x165   :  { %v450_v4 = vmax.f32 %v379_v3, 0.0  ;;  %425 = vmatmul.f32.gmra.mxu3 %v301_v1 }
 0x167   :  { %542 = vmatmul.f32.gmra.mxu2 %v450_v4 }
 0x16a   :  { %v381_v8 = vpop.f32.mrf.mxu1 }
 0x16b   :  { %v382_v9 = vadd.f32 %v1414_v51, %v381_v8 }
 0x16d   :  { %v451_v10 = vmax.f32 %v382_v9, 0.0  ;;  %428 = vmatmul.f32.gmra.mxu3 %v302_v7 }
 0x16f   :  { %545 = vmatmul.f32.gmra.mxu2 %v451_v10 }
 0x172   :  { %v384_v13 = vpop.f32.mrf.mxu1 }
 0x173   :  { %v385_v15 = vadd.f32 %v1414_v51, %v384_v13 }
 0x175   :  { %v452_v16 = vmax.f32 %v385_v15, 0.0  ;;  %431 = vmatmul.f32.gmra.mxu3 %v303_v12 }
 0x177   :  { %548 = vmatmul.f32.gmra.mxu2 %v452_v16 }
 0x17a   :  { %v387_v19 = vpop.f32.mrf.mxu1 }
 0x17b   :  { %v388_v20 = vadd.f32 %v1414_v51, %v387_v19 }
 0x17d   :  { %v453_v21 = vmax.f32 %v388_v20, 0.0  ;;  %434 = vmatmul.f32.gmra.mxu3 %v304_v18 }
 0x17f   :  { %551 = vmatmul.f32.gmra.mxu2 %v453_v21 }
 0x182   :  { %v390_v22 = vpop.f32.mrf.mxu1 }
 0x183   :  { %v391_v23 = vadd.f32 %v1414_v51, %v390_v22 }
 0x185   :  { %v454_v24 = vmax.f32 %v391_v23, 0.0 }
 0x187   :  { %554 = vmatmul.f32.gmra.mxu2 %v454_v24 }
 0x18a   :  { %v393_v26 = vpop.f32.mrf.mxu1  ;;  %v507_v33 = vpop.f32.mrf.mxu2 }
 0x18b   :  { %v394_v27 = vadd.f32 %v1414_v51, %v393_v26  ;;  %v1456_v28 = vadd.f32 %v1452_v25, %v507_v33 }
 0x18d   :  { %v455_v29 = vmax.f32 %v394_v27, 0.0  ;;  %603 = vmax.xlane.f32.xlu0 %v1456_v28 }
 0x18f   :  { %557 = vmatmul.f32.gmra.mxu2 %v455_v29 }
 0x192   :  { %v396_v30 = vpop.f32.mrf.mxu1  ;;  %v510_v31 = vpop.f32.mrf.mxu2 }
 0x193   :  { %v397_v32 = vadd.f32 %v1414_v51, %v396_v30  ;;  %v1461_v34 = vadd.f32 %v1452_v25, %v510_v31 }
 0x195   :  { %v456_v35 = vmax.f32 %v397_v32, 0.0  ;;  %605 = vmax.xlane.f32.xlu0 %v1461_v34 }
 0x197   :  { %560 = vmatmul.f32.gmra.mxu2 %v456_v35 }
 0x19a   :  { %v399_v36 = vpop.f32.mrf.mxu1  ;;  %v513_v37 = vpop.f32.mrf.mxu2 }
 0x19b   :  { %v400_v38 = vadd.f32 %v1414_v51, %v399_v36  ;;  %v1466_v39 = vadd.f32 %v1452_v25, %v513_v37 }
 0x19d   :  { %v457_v40 = vmax.f32 %v400_v38, 0.0  ;;  %607 = vmax.xlane.f32.xlu1 %v1466_v39 }
 0x19f   :  { %563 = vmatmul.f32.gmra.mxu2 %v457_v40 }
 0x1a2   :  { %v402_v41 = vpop.f32.mrf.mxu1  ;;  %v516_v42 = vpop.f32.mrf.mxu2 }
 0x1a3   :  { %v403_v43 = vadd.f32 %v1414_v51, %v402_v41  ;;  %v1471_v44 = vadd.f32 %v1452_v25, %v516_v42 }
 0x1a5   :  { %v458_v45 = vmax.f32 %v403_v43, 0.0  ;;  %609 = vmax.xlane.f32.xlu1 %v1471_v44 }
 0x1a7   :  { %566 = vmatmul.f32.gmra.mxu2 %v458_v45 }
 0x1aa   :  { %v405_v46 = vpop.f32.mrf.mxu1  ;;  %v519_v47 = vpop.f32.mrf.mxu2 }
 0x1ab   :  { %v406_v48 = vadd.f32 %v1414_v51, %v405_v46  ;;  %v1476_v49 = vadd.f32 %v1452_v25, %v519_v47 }
 0x1ad   :  { %v459_v50 = vmax.f32 %v406_v48, 0.0  ;;  %611 = vmax.xlane.f32.xlu2 %v1476_v49 }
 0x1af   :  { %569 = vmatmul.f32.gmra.mxu2 %v459_v50 }
 0x1b2   :  { %v408_v52 = vpop.f32.mrf.mxu1  ;;  %v522_v53 = vpop.f32.mrf.mxu2 }
 0x1b3   :  { %v409_v54 = vadd.f32 %v1414_v51, %v408_v52  ;;  %v1481_v55 = vadd.f32 %v1452_v25, %v522_v53 }
 0x1b5   :  { %v460_v56 = vmax.f32 %v409_v54, 0.0  ;;  %613 = vmax.xlane.f32.xlu2 %v1481_v55 }
 0x1b7   :  { %572 = vmatmul.f32.gmra.mxu2 %v460_v56 }
 0x1ba   :  { %v525_v57 = vpop.f32.mrf.mxu2 }
 0x1bb   :  { %v1485_v58 = vadd.f32 %v1452_v25, %v525_v57 }
 0x1bd   :  { %615 = vmax.xlane.f32.xlu0 %v1485_v58 }
 0x1c0   :  { %v411_v59 = vpop.f32.mrf.mxu3 }
 0x1c1   :  { %v412_v60 = vadd.f32 %v1414_v51, %v411_v59 }
 0x1c2   :  { %v528_v61 = vpop.f32.mrf.mxu2 }
 0x1c3   :  { %v461_v62 = vmax.f32 %v412_v60, 0.0  ;;  %v1490_v63 = vadd.f32 %v1452_v25, %v528_v61 }
 0x1c5   :  { %575 = vmatmul.f32.vlgmr.msra.gmra.mxu3 %v461_v62  ;;  %617 = vmax.xlane.f32.xlu1 %v1490_v63 }
 0x1c8   :  { %v414_v0 = vpop.f32.mrf.mxu3 }
 0x1c9   :  { %v415_v1 = vadd.f32 %v1414_v51, %v414_v0 }
 0x1ca   :  { %v531_v2 = vpop.f32.mrf.mxu2 }
 0x1cb   :  { %v462_v3 = vmax.f32 %v415_v1, 0.0  ;;  %v1495_v4 = vadd.f32 %v1452_v25, %v531_v2 }
 0x1cd   :  { %578 = vmatmul.f32.gmra.mxu3 %v462_v3  ;;  %619 = vmax.xlane.f32.xlu2 %v1495_v4 }
 0x1d0   :  { %v417_v5 = vpop.f32.mrf.mxu3 }
 0x1d1   :  { %v418_v6 = vadd.f32 %v1414_v51, %v417_v5 }
 0x1d2   :  { %v534_v7 = vpop.f32.mrf.mxu2 }
 0x1d3   :  { %v463_v8 = vmax.f32 %v418_v6, 0.0  ;;  %v1500_v9 = vadd.f32 %v1452_v25, %v534_v7 }
 0x1d5   :  { %581 = vmatmul.f32.gmra.mxu3 %v463_v8  ;;  %621 = vmax.xlane.f32.xlu0 %v1500_v9 }
 0x1d8   :  { %v420_v10 = vpop.f32.mrf.mxu3 }
 0x1d9   :  { %v421_v11 = vadd.f32 %v1414_v51, %v420_v10 }
 0x1da   :  { %v537_v12 = vpop.f32.mrf.mxu2 }
 0x1db   :  { %v464_v13 = vmax.f32 %v421_v11, 0.0  ;;  %v1505_v14 = vadd.f32 %v1452_v25, %v537_v12 }
 0x1dd   :  { %584 = vmatmul.f32.gmra.mxu3 %v464_v13  ;;  %623 = vmax.xlane.f32.xlu1 %v1505_v14 }
 0x1e0   :  { %v423_v15 = vpop.f32.mrf.mxu3 }
 0x1e1   :  { %v424_v16 = vadd.f32 %v1414_v51, %v423_v15 }
 0x1e2   :  { %v540_v17 = vpop.f32.mrf.mxu2 }
 0x1e3   :  { %v465_v18 = vmax.f32 %v424_v16, 0.0  ;;  %v1510_v19 = vadd.f32 %v1452_v25, %v540_v17 }
 0x1e5   :  { %587 = vmatmul.f32.gmra.mxu3 %v465_v18  ;;  %625 = vmax.xlane.f32.xlu2 %v1510_v19 }
 0x1e8   :  { %v426_v20 = vpop.f32.mrf.mxu3 }
 0x1e9   :  { %v427_v21 = vadd.f32 %v1414_v51, %v426_v20 }
 0x1ea   :  { %v543_v22 = vpop.f32.mrf.mxu2 }
 0x1eb   :  { %v466_v23 = vmax.f32 %v427_v21, 0.0  ;;  %v1515_v24 = vadd.f32 %v1452_v25, %v543_v22 }
 0x1ed   :  { %590 = vmatmul.f32.gmra.mxu3 %v466_v23  ;;  %627 = vmax.xlane.f32.xlu0 %v1515_v24 }
 0x1f0   :  { %v429_v26 = vpop.f32.mrf.mxu3 }
 0x1f1   :  { %v430_v33 = vadd.f32 %v1414_v51, %v429_v26 }
 0x1f2   :  { %v546_v27 = vpop.f32.mrf.mxu2 }
 0x1f3   :  { %v467_v29 = vmax.f32 %v430_v33, 0.0  ;;  %v1520_v30 = vadd.f32 %v1452_v25, %v546_v27 }
 0x1f5   :  { %593 = vmatmul.f32.gmra.mxu3 %v467_v29  ;;  %629 = vmax.xlane.f32.xlu1 %v1520_v30 }
 0x1f8   :  { %v432_v31 = vpop.f32.mrf.mxu3 }
 0x1f9   :  { %v433_v32 = vadd.f32 %v1414_v51, %v432_v31 }
 0x1fa   :  { %v549_v35 = vpop.f32.mrf.mxu2 }
 0x1fb   :  { %v468_v36 = vmax.f32 %v433_v32, 0.0  ;;  %v1525_v37 = vadd.f32 %v1452_v25, %v549_v35 }
 0x1fd   :  { %596 = vmatmul.f32.gmra.mxu3 %v468_v36  ;;  %631 = vmax.xlane.f32.xlu2 %v1525_v37 }
 0x200   :  { %v435_v38 = vpop.f32.mrf.mxu3  ;;  %v604_v40 = vpop.xlane.xlu0 %603 }
 0x201   :  { %v436_v41 = vadd.f32 %v1414_v51, %v435_v38  ;;  %v667_v42 = vsub.f32 %v1456_v28, %v604_v40 }
 0x202   :  { %v552_v43 = vpop.f32.mrf.mxu2 }
 0x203   :  { %v469_v45 = vmax.f32 %v436_v41, 0.0  ;;  %v699_v46 = vmul.f32 1.442695, %v667_v42  ;;  %v1531_v47 = vadd.f32 %v1452_v25, %v552_v43 }
 0x205   :  { %995 = vpow2.f32 %v699_v46  ;;  %599 = vmatmul.f32.gmra.mxu3 %v469_v45  ;;  %633 = vmax.xlane.f32.xlu0 %v1531_v47 }
 0x208   :  { %v606_v48 = vpop.xlane.xlu0 %605 }
 0x209   :  { %v668_v50 = vsub.f32 %v1461_v34, %v606_v48 }
 0x20a   :  { %v555_v52 = vpop.f32.mrf.mxu2 }
 0x20b   :  { %v1535_v53 = vpop.eup %995  ;;  %v701_v54 = vmul.f32 1.442695, %v668_v50  ;;  %v1538_v51 = vadd.f32 %v1452_v25, %v555_v52 }
 0x20c   :  { %763 = vadd.xlane.f32.xlu2 %v1535_v53 }
 0x20d   :  { %997 = vpow2.f32 %v701_v54  ;;  %635 = vmax.xlane.f32.xlu1 %v1538_v51 }
 0x210   :  { %v608_v28 = vpop.xlane.xlu1 %607 }
 0x211   :  { %v669_v56 = vsub.f32 %v1466_v39, %v608_v28 }
 0x212   :  { %v558_v57 = vpop.f32.mrf.mxu2 }
 0x213   :  { %v1543_v59 = vpop.eup %997  ;;  %v703_v60 = vmul.f32 1.442695, %v669_v56  ;;  %v1546_v34 = vadd.f32 %v1452_v25, %v558_v57 }
 0x214   :  { %765 = vadd.xlane.f32.xlu0 %v1543_v59 }
 0x215   :  { %999 = vpow2.f32 %v703_v60  ;;  %637 = vmax.xlane.f32.xlu2 %v1546_v34 }
 0x218   :  { %v610_v61 = vpop.xlane.xlu1 %609 }
 0x219   :  { %v670_v62 = vsub.f32 %v1471_v44, %v610_v61 }
 0x21a   :  { %v561_v0 = vpop.f32.mrf.mxu2 }
 0x21b   :  { %v1551_v1 = vpop.eup %999  ;;  %v705_v2 = vmul.f32 1.442695, %v670_v62  ;;  %v1554_v39 = vadd.f32 %v1452_v25, %v561_v0 }
 0x21c   :  { %767 = vadd.xlane.f32.xlu1 %v1551_v1 }
 0x21d   :  { %1001 = vpow2.f32 %v705_v2  ;;  %639 = vmax.xlane.f32.xlu0 %v1554_v39 }
 0x220   :  { %v612_v3 = vpop.xlane.xlu2 %611 }
 0x221   :  { %v671_v5 = vsub.f32 %v1476_v49, %v612_v3 }
 0x222   :  { %v564_v6 = vpop.f32.mrf.mxu2 }
 0x223   :  { %v1559_v7 = vpop.eup %1001  ;;  %v707_v8 = vmul.f32 1.442695, %v671_v5  ;;  %v1562_v44 = vadd.f32 %v1452_v25, %v564_v6 }
 0x224   :  { %769 = vadd.xlane.f32.xlu2 %v1559_v7 }
 0x225   :  { %1003 = vpow2.f32 %v707_v8  ;;  %641 = vmax.xlane.f32.xlu1 %v1562_v44 }
 0x228   :  { %v614_v10 = vpop.xlane.xlu2 %613 }
 0x229   :  { %v672_v11 = vsub.f32 %v1481_v55, %v614_v10 }
 0x22a   :  { %v567_v12 = vpop.f32.mrf.mxu2 }
 0x22b   :  { %v1567_v13 = vpop.eup %1003  ;;  %v709_v15 = vmul.f32 1.442695, %v672_v11  ;;  %v1570_v49 = vadd.f32 %v1452_v25, %v567_v12 }
 0x22c   :  { %771 = vadd.xlane.f32.xlu0 %v1567_v13 }
 0x22d   :  { %1005 = vpow2.f32 %v709_v15  ;;  %643 = vmax.xlane.f32.xlu2 %v1570_v49 }
 0x230   :  { %v616_v16 = vpop.xlane.xlu0 %615 }
 0x231   :  { %v673_v17 = vsub.f32 %v1485_v58, %v616_v16 }
 0x232   :  { %v570_v18 = vpop.f32.mrf.mxu2 }
 0x233   :  { %v1575_v20 = vpop.eup %1005  ;;  %v711_v21 = vmul.f32 1.442695, %v673_v17  ;;  %v1578_v55 = vadd.f32 %v1452_v25, %v570_v18 }
 0x234   :  { %773 = vadd.xlane.f32.xlu1 %v1575_v20 }
 0x235   :  { %1007 = vpow2.f32 %v711_v21  ;;  %645 = vmax.xlane.f32.xlu0 %v1578_v55 }
 0x238   :  { %v618_v22 = vpop.xlane.xlu1 %617 }
 0x239   :  { %v674_v23 = vsub.f32 %v1490_v63, %v618_v22 }
 0x23a   :  { %v573_v26 = vpop.f32.mrf.mxu2 }
 0x23b   :  { %v1583_v33 = vpop.eup %1007  ;;  %v713_v27 = vmul.f32 1.442695, %v674_v23  ;;  %v1586_v58 = vadd.f32 %v1452_v25, %v573_v26 }
 0x23c   :  { %775 = vadd.xlane.f32.xlu2 %v1583_v33 }
 0x23d   :  { %1009 = vpow2.f32 %v713_v27  ;;  %647 = vmax.xlane.f32.xlu1 %v1586_v58 }
 0x240   :  { %v620_v29 = vpop.xlane.xlu2 %619 }
 0x241   :  { %v675_v31 = vsub.f32 %v1495_v4, %v620_v29 }
 0x243   :  { %v1591_v32 = vpop.eup %1009  ;;  %v715_v35 = vmul.f32 1.442695, %v675_v31 }
 0x244   :  { %777 = vadd.xlane.f32.xlu0 %v1591_v32 }
 0x245   :  { %1011 = vpow2.f32 %v715_v35 }
 0x248   :  { %v576_v63 = vpop.f32.mrf.mxu3  ;;  %v622_v36 = vpop.xlane.xlu0 %621 }
 0x249   :  { %v1595_v38 = vadd.f32 %v1452_v25, %v576_v63  ;;  %v676_v40 = vsub.f32 %v1500_v9, %v622_v36 }
 0x24b   :  { %v1598_v41 = vpop.eup %1011  ;;  %v717_v42 = vmul.f32 1.442695, %v676_v40  ;;  %649 = vmax.xlane.f32.xlu2 %v1595_v38 }
 0x24c   :  { %779 = vadd.xlane.f32.xlu1 %v1598_v41 }
 0x24d   :  { %1013 = vpow2.f32 %v717_v42 }
 0x250   :  { %v579_v4 = vpop.f32.mrf.mxu3  ;;  %v624_v43 = vpop.xlane.xlu1 %623 }
 0x251   :  { %v1603_v45 = vadd.f32 %v1452_v25, %v579_v4  ;;  %v677_v46 = vsub.f32 %v1505_v14, %v624_v43 }
 0x253   :  { %v1606_v48 = vpop.eup %1013  ;;  %v719_v50 = vmul.f32 1.442695, %v677_v46  ;;  %651 = vmax.xlane.f32.xlu0 %v1603_v45 }
 0x254   :  { %781 = vadd.xlane.f32.xlu2 %v1606_v48 }
 0x255   :  { %1015 = vpow2.f32 %v719_v50 }
 0x258   :  { %v582_v9 = vpop.f32.mrf.mxu3  ;;  %v626_v60 = vpop.xlane.xlu2 %625 }
 0x259   :  { %v1611_v52 = vadd.f32 %v1452_v25, %v582_v9  ;;  %v678_v26 = vsub.f32 %v1510_v19, %v626_v60 }
 0x25b   :  { %v1613_v54 = vpop.eup %1015  ;;  %653 = vmax.xlane.f32.xlu1 %v1611_v52  ;;  %v721_v27 = vmul.f32 1.442695, %v678_v26 }
 0x25c   :  { %783 = vadd.xlane.f32.xlu0 %v1613_v54 }
 0x260   :  { %v585_v28 = vpop.f32.mrf.mxu3  ;;  %v628_v62 = vpop.xlane.xlu0 %627 }
 0x261   :  { %v1618_v14 = vadd.f32 %v1452_v25, %v585_v28  ;;  %v679_v2 = vsub.f32 %v1515_v24, %v628_v62 }
 0x263   :  { %655 = vmax.xlane.f32.xlu2 %v1618_v14  ;;  %v723_v5 = vmul.f32 1.442695, %v679_v2 }
 0x265   :  { %1017 = vpow2.f32 %v723_v5 }
 0x268   :  { %v588_v56 = vpop.f32.mrf.mxu3  ;;  %v630_v8 = vpop.xlane.xlu1 %629 }
 0x269   :  { %v1622_v57 = vadd.f32 %v1452_v25, %v588_v56  ;;  %v680_v12 = vsub.f32 %v1520_v30, %v630_v8 }
 0x26b   :  { %657 = vmax.xlane.f32.xlu0 %v1622_v57  ;;  %v725_v17 = vmul.f32 1.442695, %v680_v12  ;;  %v1639_v23 = vpop.eup %1017 }
 0x270   :  { %v591_v61 = vpop.f32.mrf.mxu3  ;;  %v632_v3 = vpop.xlane.xlu2 %631 }
 0x271   :  { %v1626_v0 = vadd.f32 %v1452_v25, %v591_v61 }
 0x273   :  { %659 = vmax.xlane.f32.xlu1 %v1626_v0 }
 0x278   :  { %v594_v6 = vpop.f32.mrf.mxu3  ;;  %v634_v11 = vpop.xlane.xlu0 %633 }
 0x279   :  { %v1631_v10 = vadd.f32 %v1452_v25, %v594_v6  ;;  %v682_v15 = vsub.f32 %v1531_v47, %v634_v11 }
 0x27b   :  { %661 = vmax.xlane.f32.xlu2 %v1631_v10  ;;  %v729_v24 = vmul.f32 1.442695, %v682_v15 }
 0x27f   :  { %v764_v16 = vpop.xlane.xlu2 %763 }
 0x280   :  { %1019 = vrcp.f32 %v764_v16  ;;  %v597_v18 = vpop.f32.mrf.mxu3  ;;  %v636_v22 = vpop.xlane.xlu1 %635 }
 0x281   :  { %v1637_v21 = vadd.f32 %v1452_v25, %v597_v18  ;;  %1021 = vpow2.f32 %v725_v17  ;;  %v683_v30 = vsub.f32 %v1538_v51, %v636_v22 }
 0x282   :  { %1023 = vpow2.f32 %v729_v24 }
 0x283   :  { %663 = vmax.xlane.f32.xlu0 %v1637_v21  ;;  %787 = vadd.xlane.f32.xlu2 %v1639_v23  ;;  %v731_v35 = vmul.f32 1.442695, %v683_v30 }
 0x286   :  { %v1020_v47 = vpop.eup %1019 }
 0x287   :  { %v859_v29 = vmul.f32 %v1020_v47, %v1535_v53  ;;  %v766_v31 = vpop.xlane.xlu0 %765  ;;  %v1652_v36 = vpop.eup %1021  ;;  %v681_v53 = vsub.f32 %v1525_v37, %v632_v3 }
 0x288   :  { %1025 = vrcp.f32 %v766_v31  ;;  %v600_v63 = vpop.f32.mrf.mxu3  ;;  %v1654_v40 = vpop.eup %1023 }
 0x289   :  { %891 = vst [vmem:[%s1860_s7] sm:$0xff] %v859_v29  ;;  %v1650_v19 = vadd.f32 %v1452_v25, %v600_v63  ;;  %1027 = vpow2.f32 %v721_v27  ;;  %v638_v4 = vpop.xlane.xlu2 %637  ;;  %v727_v43 = vmul.f32 1.442695, %v681_v53 }
 0x28a   :  { %1029 = vpow2.f32 %v731_v35 }
 0x28b   :  { %665 = vmax.xlane.f32.xlu1 %v1650_v19  ;;  %789 = vadd.xlane.f32.xlu0 %v1652_v36 }
 0x28c   :  { %793 = vadd.xlane.f32.xlu2 %v1654_v40 }
 0x28e   :  { %v1026_v51 = vpop.eup %1025 }
 0x28f   :  { %v860_v42 = vmul.f32 %v1026_v51, %v1543_v59  ;;  %v768_v25 = vpop.xlane.xlu1 %767  ;;  %v1661_v50 = vpop.eup %1027  ;;  %v684_v59 = vsub.f32 %v1546_v34, %v638_v4 }
 0x290   :  { %1031 = vrcp.f32 %v768_v25  ;;  %v640_v46 = vpop.xlane.xlu0 %639  ;;  %v1667_v37 = vpop.eup %1029 }
 0x291   :  { %892 = vst [vmem:[%s1860_s7 + $0x8] sm:$0xff] %v860_v42  ;;  %v685_v9 = vsub.f32 %v1554_v39, %v640_v46  ;;  %1033 = vpow2.f32 %v727_v43  ;;  %v733_v62 = vmul.f32 1.442695, %v684_v59 }
 0x293   :  { %v735_v28 = vmul.f32 1.442695, %v685_v9  ;;  %785 = vadd.xlane.f32.xlu1 %v1661_v50  ;;  %795 = vadd.xlane.f32.xlu0 %v1667_v37 }
 0x295   :  { %1035 = vpow2.f32 %v735_v28 }
 0x296   :  { %v1032_v56 = vpop.eup %1031 }
 0x297   :  { %v861_v60 = vmul.f32 %v1032_v56, %v1551_v1  ;;  %v770_v61 = vpop.xlane.xlu2 %769  ;;  %v1677_v3 = vpop.eup %1033 }
 0x298   :  { %1037 = vrcp.f32 %v770_v61  ;;  %v642_v2 = vpop.xlane.xlu1 %641 }
 0x299   :  { %893 = vst [vmem:[%s1860_s7 + $0x10] sm:$0xff] %v861_v60  ;;  %v686_v39 = vsub.f32 %v1562_v44, %v642_v2  ;;  %1039 = vpow2.f32 %v733_v62 }
 0x29b   :  { %v1679_v5 = vpop.eup %1035  ;;  %v737_v6 = vmul.f32 1.442695, %v686_v39  ;;  %791 = vadd.xlane.f32.xlu1 %v1677_v3 }
 0x29c   :  { %799 = vadd.xlane.f32.xlu2 %v1679_v5 }
 0x29d   :  { %1041 = vpow2.f32 %v737_v6 }
 0x29e   :  { %v1038_v34 = vpop.eup %1037 }
 0x29f   :  { %v862_v1 = vmul.f32 %v1038_v34, %v1559_v7  ;;  %v772_v8 = vpop.xlane.xlu0 %771  ;;  %v1688_v12 = vpop.eup %1039 }
 0x2a0   :  { %1043 = vrcp.f32 %v772_v8  ;;  %v644_v11 = vpop.xlane.xlu2 %643 }
 0x2a1   :  { %894 = vst [vmem:[%s1860_s7 + $0x18] sm:$0xff] %v862_v1  ;;  %v687_v44 = vsub.f32 %v1570_v49, %v644_v11 }
 0x2a3   :  { %v1690_v15 = vpop.eup %1041  ;;  %v739_v16 = vmul.f32 1.442695, %v687_v44  ;;  %797 = vadd.xlane.f32.xlu1 %v1688_v12 }
 0x2a4   :  { %801 = vadd.xlane.f32.xlu0 %v1690_v15 }
 0x2a5   :  { %1045 = vpow2.f32 %v739_v16 }
 0x2a6   :  { %v1044_v7 = vpop.eup %1043 }
 0x2a7   :  { %v863_v17 = vmul.f32 %v1044_v7, %v1567_v13  ;;  %v774_v18 = vpop.xlane.xlu1 %773 }
 0x2a8   :  { %1047 = vrcp.f32 %v774_v18  ;;  %v646_v24 = vpop.xlane.xlu0 %645 }
 0x2a9   :  { %895 = vst [vmem:[%s1860_s7 + $0x20] sm:$0xff] %v863_v17  ;;  %v688_v49 = vsub.f32 %v1578_v55, %v646_v24 }
 0x2ab   :  { %v1699_v22 = vpop.eup %1045  ;;  %v741_v26 = vmul.f32 1.442695, %v688_v49 }
 0x2ac   :  { %803 = vadd.xlane.f32.xlu1 %v1699_v22 }
 0x2ad   :  { %1049 = vpow2.f32 %v741_v26 }
 0x2ae   :  { %v1048_v30 = vpop.eup %1047 }
 0x2af   :  { %v864_v47 = vmul.f32 %v1048_v30, %v1575_v20  ;;  %v776_v27 = vpop.xlane.xlu2 %775 }
 0x2b0   :  { %1051 = vrcp.f32 %v776_v27  ;;  %v648_v13 = vpop.xlane.xlu1 %647 }
 0x2b1   :  { %896 = vst [vmem:[%s1860_s7 + $0x28] sm:$0xff] %v864_v47  ;;  %v689_v29 = vsub.f32 %v1586_v58, %v648_v13 }
 0x2b3   :  { %v1707_v31 = vpop.eup %1049  ;;  %v743_v55 = vmul.f32 1.442695, %v689_v29 }
 0x2b4   :  { %805 = vadd.xlane.f32.xlu2 %v1707_v31 }
 0x2b5   :  { %1053 = vpow2.f32 %v743_v55 }
 0x2b6   :  { %v1052_v35 = vpop.eup %1051 }
 0x2b7   :  { %v865_v63 = vmul.f32 %v1052_v35, %v1583_v33  ;;  %v778_v53 = vpop.xlane.xlu0 %777 }
 0x2b8   :  { %1055 = vrcp.f32 %v778_v53 }
 0x2b9   :  { %897 = vst [vmem:[%s1860_s7 + $0x30] sm:$0xff] %v865_v63 }
 0x2bb   :  { %v1714_v20 = vpop.eup %1053 }
 0x2bc   :  { %807 = vadd.xlane.f32.xlu0 %v1714_v20 }
 0x2be   :  { %v1056_v58 = vpop.eup %1055  ;;  %v650_v51 = vpop.xlane.xlu2 %649 }
 0x2bf   :  { %v866_v42 = vmul.f32 %v1056_v58, %v1591_v32  ;;  %v690_v4 = vsub.f32 %v1595_v38, %v650_v51  ;;  %v780_v25 = vpop.xlane.xlu1 %779 }
 0x2c0   :  { %1057 = vrcp.f32 %v780_v25 }
 0x2c1   :  { %898 = vst [vmem:[%s1860_s7 + $0x38] sm:$0xff] %v866_v42  ;;  %v745_v33 = vmul.f32 1.442695, %v690_v4 }
 0x2c3   :  { %1059 = vpow2.f32 %v745_v33 }
 0x2c6   :  { %v1058_v43 = vpop.eup %1057  ;;  %v652_v46 = vpop.xlane.xlu0 %651 }
 0x2c7   :  { %v867_v9 = vmul.f32 %v1058_v43, %v1598_v41  ;;  %v691_v28 = vsub.f32 %v1603_v45, %v652_v46  ;;  %v782_v59 = vpop.xlane.xlu2 %781 }
 0x2c8   :  { %1061 = vrcp.f32 %v782_v59 }
 0x2c9   :  { %v1724_v56 = vpop.eup %1059  ;;  %899 = vst [vmem:[%s1860_s7 + $0x40] sm:$0xff] %v867_v9  ;;  %v747_v32 = vmul.f32 1.442695, %v691_v28 }
 0x2ca   :  { %809 = vadd.xlane.f32.xlu1 %v1724_v56 }
 0x2cb   :  { %1063 = vpow2.f32 %v747_v32 }
 0x2ce   :  { %v1062_v38 = vpop.eup %1061  ;;  %v654_v60 = vpop.xlane.xlu1 %653 }
 0x2cf   :  { %v868_v61 = vmul.f32 %v1062_v38, %v1606_v48  ;;  %v692_v41 = vsub.f32 %v1611_v52, %v654_v60  ;;  %v784_v62 = vpop.xlane.xlu0 %783 }
 0x2d0   :  { %1065 = vrcp.f32 %v784_v62 }
 0x2d1   :  { %v1732_v45 = vpop.eup %1063  ;;  %900 = vst [vmem:[%s1860_s7 + $0x48] sm:$0xff] %v868_v61  ;;  %v749_v2 = vmul.f32 1.442695, %v692_v41 }
 0x2d2   :  { %811 = vadd.xlane.f32.xlu2 %v1732_v45 }
 0x2d3   :  { %1067 = vpow2.f32 %v749_v2 }
 0x2d6   :  { %v1066_v39 = vpop.eup %1065  ;;  %v656_v6 = vpop.xlane.xlu2 %655 }
 0x2d7   :  { %v869_v34 = vmul.f32 %v1066_v39, %v1613_v54  ;;  %v693_v48 = vsub.f32 %v1618_v14, %v656_v6 }
 0x2d9   :  { %v1740_v1 = vpop.eup %1067  ;;  %901 = vst [vmem:[%s1860_s7 + $0x50] sm:$0xff] %v869_v34  ;;  %v751_v52 = vmul.f32 1.442695, %v693_v48 }
 0x2da   :  { %813 = vadd.xlane.f32.xlu0 %v1740_v1 }
 0x2db   :  { %1069 = vpow2.f32 %v751_v52 }
 0x2de   :  { %v658_v8 = vpop.xlane.xlu0 %657 }
 0x2df   :  { %v694_v11 = vsub.f32 %v1622_v57, %v658_v8 }
 0x2e1   :  { %v1747_v44 = vpop.eup %1069  ;;  %v753_v16 = vmul.f32 1.442695, %v694_v11 }
 0x2e2   :  { %815 = vadd.xlane.f32.xlu1 %v1747_v44 }
 0x2e3   :  { %1071 = vpow2.f32 %v753_v16 }
 0x2e6   :  { %v660_v54 = vpop.xlane.xlu1 %659 }
 0x2e7   :  { %v695_v14 = vsub.f32 %v1626_v0, %v660_v54 }
 0x2e9   :  { %v1751_v7 = vpop.eup %1071  ;;  %v755_v17 = vmul.f32 1.442695, %v695_v14 }
 0x2ea   :  { %817 = vadd.xlane.f32.xlu2 %v1751_v7 }
 0x2eb   :  { %1073 = vpow2.f32 %v755_v17 }
 0x2ee   :  { %v662_v18 = vpop.xlane.xlu2 %661 }
 0x2ef   :  { %v696_v24 = vsub.f32 %v1631_v10, %v662_v18 }
 0x2f1   :  { %v1755_v49 = vpop.eup %1073  ;;  %v757_v57 = vmul.f32 1.442695, %v696_v24 }
 0x2f2   :  { %819 = vadd.xlane.f32.xlu0 %v1755_v49 }
 0x2f3   :  { %1075 = vpow2.f32 %v757_v57 }
 0x2f6   :  { %v788_v26 = vpop.xlane.xlu2 %787  ;;  %v664_v30 = vpop.xlane.xlu0 %663 }
 0x2f7   :  { %1077 = vrcp.f32 %v788_v26  ;;  %v697_v0 = vsub.f32 %v1637_v21, %v664_v30 }
 0x2f9   :  { %v1759_v47 = vpop.eup %1075  ;;  %v759_v27 = vmul.f32 1.442695, %v697_v0 }
 0x2fa   :  { %821 = vadd.xlane.f32.xlu1 %v1759_v47 }
 0x2fb   :  { %1079 = vpow2.f32 %v759_v27 }
 0x2fd   :  { %v1078_v13 = vpop.eup %1077 }
 0x2fe   :  { %v871_v10 = vmul.f32 %v1078_v13, %v1639_v23  ;;  %v666_v29 = vpop.xlane.xlu1 %665  ;;  %v790_v55 = vpop.xlane.xlu0 %789 }
 0x2ff   :  { %v698_v35 = vsub.f32 %v1650_v19, %v666_v29  ;;  %v794_v63 = vpop.xlane.xlu2 %793  ;;  %1081 = vrcp.f32 %v790_v55 }
 0x300   :  { %903 = vst [vmem:[%s1860_s7 + $0x60] sm:$0xff] %v871_v10  ;;  %1083 = vrcp.f32 %v794_v63 }
 0x301   :  { %v1767_v21 = vpop.eup %1079  ;;  %v761_v53 = vmul.f32 1.442695, %v698_v35 }
 0x302   :  { %823 = vadd.xlane.f32.xlu2 %v1767_v21 }
 0x303   :  { %1085 = vpow2.f32 %v761_v53 }
 0x305   :  { %v1082_v58 = vpop.eup %1081 }
 0x306   :  { %v1084_v51 = vpop.eup %1083  ;;  %v872_v23 = vmul.f32 %v1082_v58, %v1652_v36  ;;  %v786_v42 = vpop.xlane.xlu1 %785 }
 0x307   :  { %v796_v4 = vpop.xlane.xlu0 %795  ;;  %v874_v19 = vmul.f32 %v1084_v51, %v1654_v40  ;;  %1087 = vrcp.f32 %v786_v42 }
 0x308   :  { %904 = vst [vmem:[%s1860_s7 + $0x68] sm:$0xff] %v872_v23  ;;  %1089 = vrcp.f32 %v796_v4 }
 0x309   :  { %v1775_v25 = vpop.eup %1085  ;;  %906 = vst [vmem:[%s1860_s7 + $0x78] sm:$0xff] %v874_v19 }
 0x30a   :  { %825 = vadd.xlane.f32.xlu0 %v1775_v25 }
 0x30d   :  { %v1088_v33 = vpop.eup %1087 }
 0x30e   :  { %v1090_v36 = vpop.eup %1089  ;;  %v870_v43 = vmul.f32 %v1088_v33, %v1661_v50  ;;  %v792_v46 = vpop.xlane.xlu1 %791 }
 0x30f   :  { %v875_v40 = vmul.f32 %v1090_v36, %v1667_v37  ;;  %1091 = vrcp.f32 %v792_v46  ;;  %v800_v9 = vpop.xlane.xlu2 %799 }
 0x310   :  { %902 = vst [vmem:[%s1860_s7 + $0x58] sm:$0xff] %v870_v43  ;;  %1093 = vrcp.f32 %v800_v9 }
 0x311   :  { %907 = vst [vmem:[%s1860_s7 + $0x80] sm:$0xff] %v875_v40 }
 0x315   :  { %v1092_v28 = vpop.eup %1091 }
 0x316   :  { %v1094_v59 = vpop.eup %1093  ;;  %v873_v32 = vmul.f32 %v1092_v28, %v1677_v3  ;;  %v798_v38 = vpop.xlane.xlu1 %797 }
 0x317   :  { %v877_v50 = vmul.f32 %v1094_v59, %v1679_v5  ;;  %1095 = vrcp.f32 %v798_v38  ;;  %v802_v37 = vpop.xlane.xlu0 %801 }
 0x318   :  { %905 = vst [vmem:[%s1860_s7 + $0x70] sm:$0xff] %v873_v32  ;;  %1097 = vrcp.f32 %v802_v37 }
 0x319   :  { %909 = vst [vmem:[%s1860_s7 + $0x90] sm:$0xff] %v877_v50 }
 0x31d   :  { %v1096_v60 = vpop.eup %1095 }
 0x31e   :  { %v1098_v61 = vpop.eup %1097  ;;  %v876_v41 = vmul.f32 %v1096_v60, %v1688_v12 }
 0x31f   :  { %v878_v3 = vmul.f32 %v1098_v61, %v1690_v15  ;;  %v804_v62 = vpop.xlane.xlu1 %803 }
 0x320   :  { %908 = vst [vmem:[%s1860_s7 + $0x88] sm:$0xff] %v876_v41  ;;  %1099 = vrcp.f32 %v804_v62 }
 0x321   :  { %910 = vst [vmem:[%s1860_s7 + $0x98] sm:$0xff] %v878_v3 }
 0x326   :  { %v1100_v5 = vpop.eup %1099 }
 0x327   :  { %v879_v2 = vmul.f32 %v1100_v5, %v1699_v22  ;;  %v806_v39 = vpop.xlane.xlu2 %805 }
 0x328   :  { %1101 = vrcp.f32 %v806_v39 }
 0x329   :  { %911 = vst [vmem:[%s1860_s7 + $0xa0] sm:$0xff] %v879_v2 }
 0x32e   :  { %v1102_v12 = vpop.eup %1101 }
 0x32f   :  { %v880_v15 = vmul.f32 %v1102_v12, %v1707_v31  ;;  %v808_v6 = vpop.xlane.xlu0 %807 }
 0x330   :  { %1103 = vrcp.f32 %v808_v6 }
 0x331   :  { %912 = vst [vmem:[%s1860_s7 + $0xa8] sm:$0xff] %v880_v15 }
 0x336   :  { %v1104_v34 = vpop.eup %1103 }
 0x337   :  { %v881_v48 = vmul.f32 %v1104_v34, %v1714_v20 }
 0x339   :  { %913 = vst [vmem:[%s1860_s7 + $0xb0] sm:$0xff] %v881_v48 }
 0x33d   :  { %v810_v22 = vpop.xlane.xlu1 %809 }
 0x33e   :  { %1105 = vrcp.f32 %v810_v22 }
 0x344   :  { %v1106_v52 = vpop.eup %1105 }
 0x345   :  { %v882_v8 = vmul.f32 %v1106_v52, %v1724_v56  ;;  %v812_v11 = vpop.xlane.xlu2 %811 }
 0x346   :  { %1107 = vrcp.f32 %v812_v11 }
 0x347   :  { %914 = vst [vmem:[%s1860_s7 + $0xb8] sm:$0xff] %v882_v8 }
 0x34c   :  { %v1108_v31 = vpop.eup %1107 }
 0x34d   :  { %v883_v16 = vmul.f32 %v1108_v31, %v1732_v45  ;;  %v814_v54 = vpop.xlane.xlu0 %813 }
 0x34e   :  { %1109 = vrcp.f32 %v814_v54 }
 0x34f   :  { %915 = vst [vmem:[%s1860_s7 + $0xc0] sm:$0xff] %v883_v16 }
 0x354   :  { %v1110_v20 = vpop.eup %1109 }
 0x355   :  { %v884_v14 = vmul.f32 %v1110_v20, %v1740_v1  ;;  %v816_v17 = vpop.xlane.xlu1 %815 }
 0x356   :  { %1111 = vrcp.f32 %v816_v17 }
 0x357   :  { %916 = vst [vmem:[%s1860_s7 + $0xc8] sm:$0xff] %v884_v14 }
 0x35c   :  { %v1112_v56 = vpop.eup %1111 }
 0x35d   :  { %v885_v18 = vmul.f32 %v1112_v56, %v1747_v44  ;;  %v818_v24 = vpop.xlane.xlu2 %817 }
 0x35e   :  { %1113 = vrcp.f32 %v818_v24 }
 0x35f   :  { %917 = vst [vmem:[%s1860_s7 + $0xd0] sm:$0xff] %v885_v18 }
 0x364   :  { %v1114_v45 = vpop.eup %1113 }
 0x365   :  { %v886_v57 = vmul.f32 %v1114_v45, %v1751_v7  ;;  %v820_v26 = vpop.xlane.xlu0 %819 }
 0x366   :  { %1115 = vrcp.f32 %v820_v26 }
 0x367   :  { %918 = vst [vmem:[%s1860_s7 + $0xd8] sm:$0xff] %v886_v57 }
 0x36c   :  { %v1116_v1 = vpop.eup %1115 }
 0x36d   :  { %v887_v30 = vmul.f32 %v1116_v1, %v1755_v49  ;;  %v822_v0 = vpop.xlane.xlu1 %821 }
 0x36e   :  { %1117 = vrcp.f32 %v822_v0 }
 0x36f   :  { %919 = vst [vmem:[%s1860_s7 + $0xe0] sm:$0xff] %v887_v30 }
 0x374   :  { %v1118_v44 = vpop.eup %1117 }
 0x375   :  { %v888_v27 = vmul.f32 %v1118_v44, %v1759_v47  ;;  %v824_v13 = vpop.xlane.xlu2 %823 }
 0x376   :  { %1119 = vrcp.f32 %v824_v13 }
 0x377   :  { %920 = vst [vmem:[%s1860_s7 + $0xe8] sm:$0xff] %v888_v27 }
 0x37c   :  { %v1120_v7 = vpop.eup %1119 }
 0x37d   :  { %v889_v10 = vmul.f32 %v1120_v7, %v1767_v21  ;;  %v826_v29 = vpop.xlane.xlu0 %825 }
 0x37e   :  { %1121 = vrcp.f32 %v826_v29 }
 0x37f   :  { %921 = vst [vmem:[%s1860_s7 + $0xf0] sm:$0xff] %v889_v10 }
 0x384   :  { %v1122_v49 = vpop.eup %1121 }
 0x385   :  { %v890_v55 = vmul.f32 %v1122_v49, %v1775_v25 }
 0x387   :  { %922 = vst [vmem:[%s1860_s7 + $0xf8] sm:$0xff] %v890_v55 }

</bundles_post_ra>
